<compile_context>
chip_gen: v7x
topology: tpu7x:2x2x1
jax: 0.10.0
libtpu: 0.0.40
codegen_flags: <defaults>
</compile_context>

<pallas_src>
import functools

import jax
import jax.numpy as jnp
from jax import lax
from jax.experimental import pallas as pl
from jax.experimental.pallas import tpu as pltpu


def _round_up(x, m):
    return (x + m - 1) // m * m


def _layer_norm_f32(x, gamma, beta, eps=1e-12):
    # PyTorch LayerNorm over the last dim, biased variance, all in f32.
    mean = jnp.mean(x, axis=-1, keepdims=True)
    centered = x - mean
    var = jnp.mean(centered * centered, axis=-1, keepdims=True)
    return centered * lax.rsqrt(var + eps) * gamma + beta


def visual_feat_encoder_kernel(
    feats_ref, boxes_ref,
    vw_ref, vb_ref, vgamma_ref, vbeta_ref,
    bw_ref, bb_ref, bgamma_ref, bbeta_ref,
    out_ref,
):
    # visn branch: Linear (bf16 operands, f32 accumulate) + f32 LayerNorm.
    x = jnp.dot(feats_ref[...], vw_ref[...],
                preferred_element_type=jnp.float32) + vb_ref[...]
    x = _layer_norm_f32(x, vgamma_ref[...], vbeta_ref[...])

    # box branch: Linear + LayerNorm.
    y = jnp.dot(boxes_ref[...], bw_ref[...],
                preferred_element_type=jnp.float32) + bb_ref[...]
    y = _layer_norm_f32(y, bgamma_ref[...], bbeta_ref[...])

    # Average; dropout is identity at inference time.
    # TODO(synk): training-mode dropout (RNG mask + 1/(1-p) scale) not implemented.
    out_ref[...] = ((x + y) * 0.5).astype(out_ref.dtype)


@functools.partial(jax.jit, static_argnames=("block_m",))
def visual_feat_encoder(feats, boxes, params, *, block_m=512):
    """feats: [B, S, feat_dim], boxes: [B, S, pos_dim] -> [B, S, d_model] (f32)."""
    B, S, feat_dim = feats.shape
    pos_dim = boxes.shape[-1]
    d_model = params["visn_w"].shape[-1]
    M = B * S

    # bf16 activations / large weights: halves DMA traffic on the dominant
    # streams and uses the MXU bf16 path. Small params stay f32.
    feats2d = feats.reshape(M, feat_dim).astype(jnp.bfloat16)
    boxes2d = boxes.reshape(M, pos_dim).astype(jnp.bfloat16)
    visn_w = params["visn_w"].astype(jnp.bfloat16)
    box_w = params["box_w"].astype(jnp.bfloat16)
    visn_b = params["visn_b"].astype(jnp.float32)
    visn_gamma = params["visn_gamma"].astype(jnp.float32)
    visn_beta = params["visn_beta"].astype(jnp.float32)
    box_b = params["box_b"].astype(jnp.float32)
    box_gamma = params["box_gamma"].astype(jnp.float32)
    box_beta = params["box_beta"].astype(jnp.float32)

    # Large token tile (prefer 512) clamped to the (8-aligned) problem size so
    # tiny demo shapes don't pad to a full 512-row tile; ragged M is handled
    # by zero-padding the token axis and slicing the result.
    block_m = max(8, min(block_m, _round_up(M, 8)))
    M_pad = _round_up(M, block_m)
    if M_pad != M:
        pad = M_pad - M
        feats2d = jnp.pad(feats2d, ((0, pad), (0, 0)))
        boxes2d = jnp.pad(boxes2d, ((0, pad), (0, 0)))

    grid = (M_pad // block_m,)

    full = lambda shape: pl.BlockSpec(shape, lambda i: (0, 0))

    cost = pl.CostEstimate(
        flops=2 * M_pad * (feat_dim + pos_dim) * d_model,
        transcendentals=2 * M_pad,  # one rsqrt per LayerNorm row, two LNs
        bytes_accessed=(
            M_pad * (feat_dim + pos_dim) * 2        # bf16 activations in
            + (feat_dim + pos_dim) * d_model * 2    # bf16 weights
            + 6 * d_model * 4                       # biases / gamma / beta
            + M_pad * d_model * 4                   # f32 output
        ),
    )

    out2d = pl.pallas_call(
        visual_feat_encoder_kernel,
        out_shape=jax.ShapeDtypeStruct((M_pad, d_model), jnp.float32),
        grid_spec=pltpu.PrefetchScalarGridSpec(
            num_scalar_prefetch=0,
            grid=grid,
            in_specs=[
                pl.BlockSpec((block_m, feat_dim), lambda i: (i, 0)),  # feats tile
                pl.BlockSpec((block_m, pos_dim), lambda i: (i, 0)),   # boxes tile
                full((feat_dim, d_model)),   # visn_fc weight (pre-transposed)
                full((1, d_model)),          # visn_fc bias
                full((1, d_model)),          # visn_layer_norm gamma
                full((1, d_model)),          # visn_layer_norm beta
                full((pos_dim, d_model)),    # box_fc weight (pre-transposed)
                full((1, d_model)),          # box_fc bias
                full((1, d_model)),          # box_layer_norm gamma
                full((1, d_model)),          # box_layer_norm beta
            ],
            out_specs=pl.BlockSpec((block_m, d_model), lambda i: (i, 0)),
        ),
        compiler_params=pltpu.CompilerParams(
            # Token axis is embarrassingly parallel -> megacore sharding on v7x.
            dimension_semantics=("parallel",),
            # > v5e's 16 MiB scoped default, < v7x's 64 MiB physical VMEM.
            vmem_limit_bytes=48 * 1024 * 1024,
        ),
        cost_estimate=cost,
    )(
        feats2d, boxes2d,
        visn_w, visn_b, visn_gamma, visn_beta,
        box_w, box_b, box_gamma, box_beta,
    )
    return out2d[:M].reshape(B, S, d_model)


def reference(feats2d, boxes2d, params):
    """Pure-JAX reference with the same bf16 operand / f32 accumulate recipe."""
    fw = params["visn_w"].astype(jnp.bfloat16)
    bw = params["box_w"].astype(jnp.bfloat16)
    x = jnp.dot(feats2d.astype(jnp.bfloat16), fw,
                preferred_element_type=jnp.float32) + params["visn_b"]
    x = _layer_norm_f32(x, params["visn_gamma"], params["visn_beta"])
    y = jnp.dot(boxes2d.astype(jnp.bfloat16), bw,
                preferred_element_type=jnp.float32) + params["box_b"]
    y = _layer_norm_f32(y, params["box_gamma"], params["box_beta"])
    return (x + y) * 0.5


def make_params(key, feat_dim, pos_dim, d_model):
    ks = jax.random.split(key, 4)
    return {
        # Stored as [in_dim, d_model] (== PyTorch weight.T), deterministic init.
        "visn_w": (jax.random.normal(ks[0], (feat_dim, d_model), jnp.float32)
                   * (1.0 / feat_dim ** 0.5)),
        "visn_b": jax.random.normal(ks[1], (1, d_model), jnp.float32) * 0.02,
        "visn_gamma": jnp.ones((1, d_model), jnp.float32),
        "visn_beta": jnp.zeros((1, d_model), jnp.float32),
        "box_w": (jax.random.normal(ks[2], (pos_dim, d_model), jnp.float32)
                  * (1.0 / pos_dim ** 0.5)),
        "box_b": jax.random.normal(ks[3], (1, d_model), jnp.float32) * 0.02,
        "box_gamma": jnp.ones((1, d_model), jnp.float32),
        "box_beta": jnp.zeros((1, d_model), jnp.float32),
    }


if __name__ == "__main__":
    # Module-consistent small shapes: clip_name='ViT-B/32' -> feat_dim=1024,
    # pos_dim=2048 (fixed in the module), d_model=128, batch=2, seq=8.
    B, S = 2, 8
    FEAT_DIM, POS_DIM, D_MODEL = 1024, 2048, 128

    key = jax.random.PRNGKey(0)
    k_feat, k_box, k_param = jax.random.split(key, 3)
    feats = jax.random.normal(k_feat, (B, S, FEAT_DIM), jnp.float32)
    boxes = jax.random.normal(k_box, (B, S, POS_DIM), jnp.float32)
    params = make_params(k_param, FEAT_DIM, POS_DIM, D_MODEL)

    out = visual_feat_encoder(feats, boxes, params)
    out = jax.block_until_ready(out)

    ref = reference(feats.reshape(B * S, FEAT_DIM),
                    boxes.reshape(B * S, POS_DIM), params).reshape(B, S, D_MODEL)
    assert out.shape == (B, S, D_MODEL)
    assert jnp.allclose(out, ref, atol=2e-3, rtol=2e-3), "mismatch vs reference"

    print("KERNEL_OK")
</pallas_src>

<mosaic_0001>
module attributes {stable_mosaic.version = 11 : i64} {
  func.func @visual_feat_encoder_kernel(%arg0: i32, %arg1: memref<16x1024xbf16, #tpu.memory_space<vmem>>, %arg2: memref<16x2048xbf16, #tpu.memory_space<vmem>>, %arg3: memref<1024x128xbf16, #tpu.memory_space<vmem>>, %arg4: memref<1x128xf32, #tpu.memory_space<vmem>>, %arg5: memref<1x128xf32, #tpu.memory_space<vmem>>, %arg6: memref<1x128xf32, #tpu.memory_space<vmem>>, %arg7: memref<2048x128xbf16, #tpu.memory_space<vmem>>, %arg8: memref<1x128xf32, #tpu.memory_space<vmem>>, %arg9: memref<1x128xf32, #tpu.memory_space<vmem>>, %arg10: memref<1x128xf32, #tpu.memory_space<vmem>>, %arg11: memref<16x128xf32, #tpu.memory_space<vmem>>) attributes {dimension_semantics = [#tpu.dimension_semantics<parallel>], iteration_bounds = array<i64: 1>, scalar_prefetch = 0 : i64, scratch_operands = 0 : i64, tpu.core_type = #tpu.core_type<tc>, window_params = [{transform_indices = @transform_0, window_bounds = array<i64: 16, 1024>}, {transform_indices = @transform_1, window_bounds = array<i64: 16, 2048>}, {pipeline_mode = #tpu.pipeline_mode<synchronous>, transform_indices = @transform_2, window_bounds = array<i64: 1024, 128>}, {pipeline_mode = #tpu.pipeline_mode<synchronous>, transform_indices = @transform_3, window_bounds = array<i64: 1, 128>}, {pipeline_mode = #tpu.pipeline_mode<synchronous>, transform_indices = @transform_4, window_bounds = array<i64: 1, 128>}, {pipeline_mode = #tpu.pipeline_mode<synchronous>, transform_indices = @transform_5, window_bounds = array<i64: 1, 128>}, {pipeline_mode = #tpu.pipeline_mode<synchronous>, transform_indices = @transform_6, window_bounds = array<i64: 2048, 128>}, {pipeline_mode = #tpu.pipeline_mode<synchronous>, transform_indices = @transform_7, window_bounds = array<i64: 1, 128>}, {pipeline_mode = #tpu.pipeline_mode<synchronous>, transform_indices = @transform_8, window_bounds = array<i64: 1, 128>}, {pipeline_mode = #tpu.pipeline_mode<synchronous>, transform_indices = @transform_9, window_bounds = array<i64: 1, 128>}, {transform_indices = @transform_10, window_bounds = array<i64: 16, 128>}]} {
    %c0 = arith.constant 0 : index
    %c0_0 = arith.constant 0 : index
    %0 = vector.load %arg1[%c0, %c0_0] : memref<16x1024xbf16, #tpu.memory_space<vmem>>, vector<16x1024xbf16>
    %c0_1 = arith.constant 0 : index
    %c0_2 = arith.constant 0 : index
    %1 = vector.load %arg3[%c0_1, %c0_2] : memref<1024x128xbf16, #tpu.memory_space<vmem>>, vector<1024x128xbf16>
    %cst = arith.constant dense<0.000000e+00> : vector<16x128xf32>
    %2 = tpu.matmul %0, %1, %cst {dimension_numbers = #tpu.dot_dimension_numbers<[1], [0], [0], [1], [0, 0, 1, 1], [], []>} : vector<16x1024xbf16>, vector<1024x128xbf16>, vector<16x128xf32> -> vector<16x128xf32>
    %c0_3 = arith.constant 0 : index
    %c0_4 = arith.constant 0 : index
    %3 = vector.load %arg4[%c0_3, %c0_4] : memref<1x128xf32, #tpu.memory_space<vmem>>, vector<1x128xf32>
    %4 = vector.broadcast %3 : vector<1x128xf32> to vector<16x128xf32>
    %5 = arith.addf %2, %4 : vector<16x128xf32>
    %c0_5 = arith.constant 0 : index
    %c0_6 = arith.constant 0 : index
    %6 = vector.load %arg5[%c0_5, %c0_6] : memref<1x128xf32, #tpu.memory_space<vmem>>, vector<1x128xf32>
    %c0_7 = arith.constant 0 : index
    %c0_8 = arith.constant 0 : index
    %7 = vector.load %arg6[%c0_7, %c0_8] : memref<1x128xf32, #tpu.memory_space<vmem>>, vector<1x128xf32>
    %cst_9 = arith.constant dense<0.000000e+00> : vector<16xf32>
    %8 = vector.multi_reduction <add>, %5, %cst_9 [1] : vector<16x128xf32> to vector<16xf32>
    %9 = vector.shape_cast %8 : vector<16xf32> to vector<16x1xf32>
    %cst_10 = arith.constant 1.280000e+02 : f32
    %10 = vector.broadcast %cst_10 : f32 to vector<16x1xf32>
    %11 = arith.divf %9, %10 : vector<16x1xf32>
    %12 = vector.broadcast %11 : vector<16x1xf32> to vector<16x128xf32>
    %13 = arith.subf %5, %12 : vector<16x128xf32>
    %14 = arith.mulf %13, %13 : vector<16x128xf32>
    %cst_11 = arith.constant dense<0.000000e+00> : vector<16xf32>
    %15 = vector.multi_reduction <add>, %14, %cst_11 [1] : vector<16x128xf32> to vector<16xf32>
    %16 = vector.shape_cast %15 : vector<16xf32> to vector<16x1xf32>
    %cst_12 = arith.constant 1.280000e+02 : f32
    %17 = vector.broadcast %cst_12 : f32 to vector<16x1xf32>
    %18 = arith.divf %16, %17 : vector<16x1xf32>
    %cst_13 = arith.constant 9.99999996E-13 : f32
    %19 = vector.broadcast %cst_13 : f32 to vector<16x1xf32>
    %20 = arith.addf %18, %19 : vector<16x1xf32>
    %21 = math.rsqrt %20 : vector<16x1xf32>
    %22 = vector.broadcast %21 : vector<16x1xf32> to vector<16x128xf32>
    %23 = arith.mulf %13, %22 : vector<16x128xf32>
    %24 = vector.broadcast %6 : vector<1x128xf32> to vector<16x128xf32>
    %25 = arith.mulf %23, %24 : vector<16x128xf32>
    %26 = vector.broadcast %7 : vector<1x128xf32> to vector<16x128xf32>
    %27 = arith.addf %25, %26 : vector<16x128xf32>
    %c0_14 = arith.constant 0 : index
    %c0_15 = arith.constant 0 : index
    %28 = vector.load %arg2[%c0_14, %c0_15] : memref<16x2048xbf16, #tpu.memory_space<vmem>>, vector<16x2048xbf16>
    %c0_16 = arith.constant 0 : index
    %c0_17 = arith.constant 0 : index
    %29 = vector.load %arg7[%c0_16, %c0_17] : memref<2048x128xbf16, #tpu.memory_space<vmem>>, vector<2048x128xbf16>
    %cst_18 = arith.constant dense<0.000000e+00> : vector<16x128xf32>
    %30 = tpu.matmul %28, %29, %cst_18 {dimension_numbers = #tpu.dot_dimension_numbers<[1], [0], [0], [1], [0, 0, 1, 1], [], []>} : vector<16x2048xbf16>, vector<2048x128xbf16>, vector<16x128xf32> -> vector<16x128xf32>
    %c0_19 = arith.constant 0 : index
    %c0_20 = arith.constant 0 : index
    %31 = vector.load %arg8[%c0_19, %c0_20] : memref<1x128xf32, #tpu.memory_space<vmem>>, vector<1x128xf32>
    %32 = vector.broadcast %31 : vector<1x128xf32> to vector<16x128xf32>
    %33 = arith.addf %30, %32 : vector<16x128xf32>
    %c0_21 = arith.constant 0 : index
    %c0_22 = arith.constant 0 : index
    %34 = vector.load %arg9[%c0_21, %c0_22] : memref<1x128xf32, #tpu.memory_space<vmem>>, vector<1x128xf32>
    %c0_23 = arith.constant 0 : index
    %c0_24 = arith.constant 0 : index
    %35 = vector.load %arg10[%c0_23, %c0_24] : memref<1x128xf32, #tpu.memory_space<vmem>>, vector<1x128xf32>
    %cst_25 = arith.constant dense<0.000000e+00> : vector<16xf32>
    %36 = vector.multi_reduction <add>, %33, %cst_25 [1] : vector<16x128xf32> to vector<16xf32>
    %37 = vector.shape_cast %36 : vector<16xf32> to vector<16x1xf32>
    %cst_26 = arith.constant 1.280000e+02 : f32
    %38 = vector.broadcast %cst_26 : f32 to vector<16x1xf32>
    %39 = arith.divf %37, %38 : vector<16x1xf32>
    %40 = vector.broadcast %39 : vector<16x1xf32> to vector<16x128xf32>
    %41 = arith.subf %33, %40 : vector<16x128xf32>
    %42 = arith.mulf %41, %41 : vector<16x128xf32>
    %cst_27 = arith.constant dense<0.000000e+00> : vector<16xf32>
    %43 = vector.multi_reduction <add>, %42, %cst_27 [1] : vector<16x128xf32> to vector<16xf32>
    %44 = vector.shape_cast %43 : vector<16xf32> to vector<16x1xf32>
    %cst_28 = arith.constant 1.280000e+02 : f32
    %45 = vector.broadcast %cst_28 : f32 to vector<16x1xf32>
    %46 = arith.divf %44, %45 : vector<16x1xf32>
    %cst_29 = arith.constant 9.99999996E-13 : f32
    %47 = vector.broadcast %cst_29 : f32 to vector<16x1xf32>
    %48 = arith.addf %46, %47 : vector<16x1xf32>
    %49 = math.rsqrt %48 : vector<16x1xf32>
    %50 = vector.broadcast %49 : vector<16x1xf32> to vector<16x128xf32>
    %51 = arith.mulf %41, %50 : vector<16x128xf32>
    %52 = vector.broadcast %34 : vector<1x128xf32> to vector<16x128xf32>
    %53 = arith.mulf %51, %52 : vector<16x128xf32>
    %54 = vector.broadcast %35 : vector<1x128xf32> to vector<16x128xf32>
    %55 = arith.addf %53, %54 : vector<16x128xf32>
    %56 = arith.addf %27, %55 : vector<16x128xf32>
    %cst_30 = arith.constant 5.000000e-01 : f32
    %57 = vector.broadcast %cst_30 : f32 to vector<16x128xf32>
    %58 = arith.mulf %56, %57 : vector<16x128xf32>
    %c0_31 = arith.constant 0 : index
    %c0_32 = arith.constant 0 : index
    %59 = vector.load %arg11[%c0_31, %c0_32] : memref<16x128xf32, #tpu.memory_space<vmem>>, vector<16x128xf32>
    tpu.vector_store %arg11[%c0_31, %c0_32], %58 {strides = array<i32>} : memref<16x128xf32, #tpu.memory_space<vmem>>, vector<16x128xf32>,
    return
  }
  func.func @transform_0(%arg0: i32) -> (i32, i32) {
    %c0_i32 = arith.constant 0 : i32
    %c0_i32_0 = arith.constant 0 : i32
    return %arg0, %c0_i32 : i32, i32
  }
  func.func @transform_1(%arg0: i32) -> (i32, i32) {
    %c0_i32 = arith.constant 0 : i32
    %c0_i32_0 = arith.constant 0 : i32
    return %arg0, %c0_i32 : i32, i32
  }
  func.func @transform_2(%arg0: i32) -> (i32, i32) {
    %c0_i32 = arith.constant 0 : i32
    %c0_i32_0 = arith.constant 0 : i32
    %c0_i32_1 = arith.constant 0 : i32
    return %c0_i32, %c0_i32_0 : i32, i32
  }
  func.func @transform_3(%arg0: i32) -> (i32, i32) {
    %c0_i32 = arith.constant 0 : i32
    %c0_i32_0 = arith.constant 0 : i32
    %c0_i32_1 = arith.constant 0 : i32
    return %c0_i32, %c0_i32_0 : i32, i32
  }
  func.func @transform_4(%arg0: i32) -> (i32, i32) {
    %c0_i32 = arith.constant 0 : i32
    %c0_i32_0 = arith.constant 0 : i32
    %c0_i32_1 = arith.constant 0 : i32
    return %c0_i32, %c0_i32_0 : i32, i32
  }
  func.func @transform_5(%arg0: i32) -> (i32, i32) {
    %c0_i32 = arith.constant 0 : i32
    %c0_i32_0 = arith.constant 0 : i32
    %c0_i32_1 = arith.constant 0 : i32
    return %c0_i32, %c0_i32_0 : i32, i32
  }
  func.func @transform_6(%arg0: i32) -> (i32, i32) {
    %c0_i32 = arith.constant 0 : i32
    %c0_i32_0 = arith.constant 0 : i32
    %c0_i32_1 = arith.constant 0 : i32
    return %c0_i32, %c0_i32_0 : i32, i32
  }
  func.func @transform_7(%arg0: i32) -> (i32, i32) {
    %c0_i32 = arith.constant 0 : i32
    %c0_i32_0 = arith.constant 0 : i32
    %c0_i32_1 = arith.constant 0 : i32
    return %c0_i32, %c0_i32_0 : i32, i32
  }
  func.func @transform_8(%arg0: i32) -> (i32, i32) {
    %c0_i32 = arith.constant 0 : i32
    %c0_i32_0 = arith.constant 0 : i32
    %c0_i32_1 = arith.constant 0 : i32
    return %c0_i32, %c0_i32_0 : i32, i32
  }
  func.func @transform_9(%arg0: i32) -> (i32, i32) {
    %c0_i32 = arith.constant 0 : i32
    %c0_i32_0 = arith.constant 0 : i32
    %c0_i32_1 = arith.constant 0 : i32
    return %c0_i32, %c0_i32_0 : i32, i32
  }
  func.func @transform_10(%arg0: i32) -> (i32, i32) {
    %c0_i32 = arith.constant 0 : i32
    %c0_i32_0 = arith.constant 0 : i32
    return %arg0, %c0_i32 : i32, i32
  }
}

</mosaic_0001>

<bundles_post_ra>
// kernel: visual_feat_encoder.1
= control target key start
LH: loop header
LB: loop body
LE: loop exit
PB: predicated region body
PF: predicated region fallthrough
CT: control target
= control target key end

     0   :  { %s3783_s0 = inlined_call_operand.vmem [shape: bf16[16,1024], index: 0, kind: input, shape index: {}]   ;;  %s3784_s1 = inlined_call_operand.vmem [shape: bf16[16,2048], index: 1, kind: input, shape index: {}]   ;;  %s3785_s2 = inlined_call_operand.vmem [shape: bf16[1024,128], index: 2, kind: input, shape index: {}]   ;;  %s3786_s3 = inlined_call_operand.vmem [shape: f32[1,128], index: 3, kind: input, shape index: {}]   ;;  %s3787_s4 = inlined_call_operand.vmem [shape: f32[1,128], index: 4, kind: input, shape index: {}]   ;;  %s3788_s5 = inlined_call_operand.vmem [shape: f32[1,128], index: 5, kind: input, shape index: {}]   ;;  %s3789_s6 = inlined_call_operand.vmem [shape: bf16[2048,128], index: 6, kind: input, shape index: {}]   ;;  %s3790_s7 = inlined_call_operand.vmem [shape: f32[1,128], index: 7, kind: input, shape index: {}]   ;;  %s3791_s8 = inlined_call_operand.vmem [shape: f32[1,128], index: 8, kind: input, shape index: {}]   ;;  %s3792_s9 = inlined_call_operand.vmem [shape: f32[1,128], index: 9, kind: input, shape index: {}]   ;;  %s3793_s10 = inlined_call_operand.hbm [shape: f32[16,128], index: 10, kind: output, shape index: {}]  }
   0x1   :  { %v2815_v0 = vld [vmem:[%s3785_s2 + $0x40] sm:$0xff]   ;;  %v2819_v4 = vld [vmem:[%s3785_s2 + $0x48] sm:$0xff]   ;;  %v2823_v8 = vld [vmem:[%s3785_s2 + $0x50] sm:$0xff]  }
   0x2   :  { %v2816_v1 = vld [vmem:[%s3785_s2 + $0xc0] sm:$0xff]   ;;  %2548 = vmatprep.subr.bf16.mxu0 %v2815_v0  ;;  %v2820_v5 = vld [vmem:[%s3785_s2 + $0xc8] sm:$0xff]   ;;  %v2824_v9 = vld [vmem:[%s3785_s2 + $0xd0] sm:$0xff]  }
   0x3   :  { %v2817_v2 = vld [vmem:[%s3785_s2] sm:$0xff]   ;;  %2570 = vmatprep.subr.bf16.mxu1 %v2816_v1  ;;  %v2821_v6 = vld [vmem:[%s3785_s2 + $0x8] sm:$0xff]   ;;  %v2825_v10 = vld [vmem:[%s3785_s2 + $0x10] sm:$0xff]  }
   0x4   :  { %v2818_v3 = vld [vmem:[%s3785_s2 + $0x80] sm:$0xff]   ;;  %2549 = vmatpush3.bf16.msra.mxu0 %v2817_v2  ;;  %v2822_v7 = vld [vmem:[%s3785_s2 + $0x88] sm:$0xff]   ;;  %v2826_v11 = vld [vmem:[%s3785_s2 + $0x90] sm:$0xff]  }
   0x5   :  { %2571 = vmatpush3.bf16.msra.mxu1 %v2818_v3  ;;  %2550 = vmatprep.subr.bf16.mxu0 %v2819_v4  ;;  %v2827_v12 = vld [vmem:[%s3785_s2 + $0x58] sm:$0xff]   ;;  %v2831_v16 = vld [vmem:[%s3785_s2 + $0x60] sm:$0xff]   ;;  %v2835_v20 = vld [vmem:[%s3785_s2 + $0x68] sm:$0xff]  }
   0x6   :  { %2572 = vmatprep.subr.bf16.mxu1 %v2820_v5  ;;  %v2828_v13 = vld [vmem:[%s3785_s2 + $0xd8] sm:$0xff]   ;;  %v2832_v17 = vld [vmem:[%s3785_s2 + $0xe0] sm:$0xff]   ;;  %v2836_v21 = vld [vmem:[%s3785_s2 + $0xe8] sm:$0xff]  }
   0x7   :  { %v2829_v14 = vld [vmem:[%s3785_s2 + $0x18] sm:$0xff]   ;;  %v2833_v18 = vld [vmem:[%s3785_s2 + $0x20] sm:$0xff]   ;;  %v2837_v22 = vld [vmem:[%s3785_s2 + $0x28] sm:$0xff]  }
   0x8   :  { %2551 = vmatpush3.bf16.msra.mxu0 %v2821_v6  ;;  %v2830_v15 = vld [vmem:[%s3785_s2 + $0x98] sm:$0xff]   ;;  %v2834_v19 = vld [vmem:[%s3785_s2 + $0xa0] sm:$0xff]   ;;  %v2838_v23 = vld [vmem:[%s3785_s2 + $0xa8] sm:$0xff]  }
   0x9   :  { %2573 = vmatpush3.bf16.msra.mxu1 %v2822_v7  ;;  %2552 = vmatprep.subr.bf16.mxu0 %v2823_v8  ;;  %v2839_v24 = vld [vmem:[%s3785_s2 + $0x70] sm:$0xff]   ;;  %v2843_v28 = vld [vmem:[%s3785_s2 + $0x78] sm:$0xff]   ;;  %v37_v32 = vld [vmem:[%s3783_s0] sm:$0xff] }
   0xa   :  { %2574 = vmatprep.subr.bf16.mxu1 %v2824_v9  ;;  %v2840_v25 = vld [vmem:[%s3785_s2 + $0xf0] sm:$0xff]   ;;  %v2844_v29 = vld [vmem:[%s3785_s2 + $0xf8] sm:$0xff]   ;;  %v41_v33 = vld [vmem:[%s3783_s0 + $0x20] sm:$0xff] }
   0xb   :  { %v2841_v26 = vld [vmem:[%s3785_s2 + $0x30] sm:$0xff]   ;;  %v2845_v30 = vld [vmem:[%s3785_s2 + $0x38] sm:$0xff]   ;;  %v38_v34 = vld [vmem:[%s3783_s0 + $0x8] sm:$0xff]  ;;  %v2327_v35 = vcombine.low %v37_v32, %v41_v33  ;;  %v2328_v36 = vcombine.high %v37_v32, %v41_v33 }
   0xc   :  { %2553 = vmatpush3.bf16.msra.mxu0 %v2825_v10  ;;  %v2842_v27 = vld [vmem:[%s3785_s2 + $0xb0] sm:$0xff]   ;;  %v2846_v31 = vld [vmem:[%s3785_s2 + $0xb8] sm:$0xff]   ;;  %v42_v37 = vld [vmem:[%s3783_s0 + $0x28] sm:$0xff] }
   0xd   :  { %2575 = vmatpush3.bf16.msra.mxu1 %v2826_v11  ;;  %2554 = vmatprep.subr.bf16.mxu0 %v2827_v12  ;;  %v2329_v38 = vcombine.low %v38_v34, %v42_v37  ;;  %v2330_v39 = vcombine.high %v38_v34, %v42_v37  ;;  %v2847_v40 = vld [vmem:[%s3785_s2 + $0x140] sm:$0xff]   ;;  %v2851_v44 = vld [vmem:[%s3785_s2 + $0x148] sm:$0xff]   ;;  %v2855_v48 = vld [vmem:[%s3785_s2 + $0x150] sm:$0xff]  }
   0xe   :  { %2576 = vmatprep.subr.bf16.mxu1 %v2828_v13  ;;  %636 = vmatprep.mubr.bf16.mxu0 %v2328_v36  ;;  %v2848_v41 = vld [vmem:[%s3785_s2 + $0x1c0] sm:$0xff]   ;;  %v2852_v45 = vld [vmem:[%s3785_s2 + $0x1c8] sm:$0xff]   ;;  %v2856_v49 = vld [vmem:[%s3785_s2 + $0x1d0] sm:$0xff]  }
   0xf   :  { %677 = vmatprep.mubr.bf16.mxu1 %v2330_v39  ;;  %v2849_v42 = vld [vmem:[%s3785_s2 + $0x100] sm:$0xff]   ;;  %v2853_v46 = vld [vmem:[%s3785_s2 + $0x108] sm:$0xff]   ;;  %v2857_v50 = vld [vmem:[%s3785_s2 + $0x110] sm:$0xff]  }
  0x10   :  { %2555 = vmatpush3.bf16.msra.mxu0 %v2829_v14  ;;  %v2850_v43 = vld [vmem:[%s3785_s2 + $0x180] sm:$0xff]   ;;  %v2854_v47 = vld [vmem:[%s3785_s2 + $0x188] sm:$0xff]   ;;  %v2858_v51 = vld [vmem:[%s3785_s2 + $0x190] sm:$0xff]  }
  0x11   :  { %2577 = vmatpush3.bf16.msra.mxu1 %v2830_v15  ;;  %2556 = vmatprep.subr.bf16.mxu0 %v2831_v16  ;;  %v2859_v52 = vld [vmem:[%s3785_s2 + $0x158] sm:$0xff]   ;;  %v2863_v56 = vld [vmem:[%s3785_s2 + $0x160] sm:$0xff]   ;;  %v2867_v60 = vld [vmem:[%s3785_s2 + $0x168] sm:$0xff]  }
  0x12   :  { %2578 = vmatprep.subr.bf16.mxu1 %v2832_v17  ;;  %v2860_v53 = vld [vmem:[%s3785_s2 + $0x1d8] sm:$0xff]   ;;  %v2864_v57 = vld [vmem:[%s3785_s2 + $0x1e0] sm:$0xff]   ;;  %v2868_v61 = vld [vmem:[%s3785_s2 + $0x1e8] sm:$0xff]  }
  0x13   :  { %v2861_v54 = vld [vmem:[%s3785_s2 + $0x118] sm:$0xff]   ;;  %v2865_v58 = vld [vmem:[%s3785_s2 + $0x120] sm:$0xff]   ;;  %v2869_v62 = vld [vmem:[%s3785_s2 + $0x128] sm:$0xff]  }
  0x14   :  { %2557 = vmatpush3.bf16.msra.mxu0 %v2833_v18  ;;  %v2862_v55 = vld [vmem:[%s3785_s2 + $0x198] sm:$0xff]   ;;  %v2866_v59 = vld [vmem:[%s3785_s2 + $0x1a0] sm:$0xff]   ;;  %v2870_v63 = vld [vmem:[%s3785_s2 + $0x1a8] sm:$0xff]  }
  0x15   :  { %2579 = vmatpush3.bf16.msra.mxu1 %v2834_v19  ;;  %2558 = vmatprep.subr.bf16.mxu0 %v2835_v20  ;;  %v2871_v0 = vld [vmem:[%s3785_s2 + $0x170] sm:$0xff]   ;;  %v2875_v4 = vld [vmem:[%s3785_s2 + $0x178] sm:$0xff]   ;;  %v2879_v16 = vld [vmem:[%s3789_s6 + $0x40] sm:$0xff]  }
  0x16   :  { %2580 = vmatprep.subr.bf16.mxu1 %v2836_v21  ;;  %v2872_v1 = vld [vmem:[%s3785_s2 + $0x1f0] sm:$0xff]   ;;  %v2876_v5 = vld [vmem:[%s3785_s2 + $0x1f8] sm:$0xff]   ;;  %v2880_v17 = vld [vmem:[%s3789_s6 + $0xc0] sm:$0xff]  }
  0x17   :  { %v2873_v2 = vld [vmem:[%s3785_s2 + $0x130] sm:$0xff]   ;;  %v2877_v6 = vld [vmem:[%s3785_s2 + $0x138] sm:$0xff]   ;;  %v2881_v18 = vld [vmem:[%s3789_s6] sm:$0xff]  }
  0x18   :  { %2559 = vmatpush3.bf16.msra.mxu0 %v2837_v22  ;;  %v2874_v3 = vld [vmem:[%s3785_s2 + $0x1b0] sm:$0xff]   ;;  %v2878_v7 = vld [vmem:[%s3785_s2 + $0x1b8] sm:$0xff]   ;;  %v2882_v19 = vld [vmem:[%s3789_s6 + $0x80] sm:$0xff]  }
  0x19   :  { %2581 = vmatpush3.bf16.msra.mxu1 %v2838_v23  ;;  %2560 = vmatprep.subr.bf16.mxu0 %v2839_v24  ;;  %v39_v8 = vld [vmem:[%s3783_s0 + $0x10] sm:$0xff]  ;;  %v40_v12 = vld [vmem:[%s3783_s0 + $0x18] sm:$0xff]  ;;  %v2883_v20 = vld [vmem:[%s3789_s6 + $0x48] sm:$0xff]  }
  0x1a   :  { %2582 = vmatprep.subr.bf16.mxu1 %v2840_v25  ;;  %v43_v9 = vld [vmem:[%s3783_s0 + $0x30] sm:$0xff]  ;;  %v44_v13 = vld [vmem:[%s3783_s0 + $0x38] sm:$0xff]  ;;  %v2884_v21 = vld [vmem:[%s3789_s6 + $0xc8] sm:$0xff]  }
  0x1b   :  { %v2331_v10 = vcombine.low %v39_v8, %v43_v9  ;;  %v2332_v11 = vcombine.high %v39_v8, %v43_v9  ;;  %v2333_v14 = vcombine.low %v40_v12, %v44_v13  ;;  %v2334_v15 = vcombine.high %v40_v12, %v44_v13  ;;  %v2885_v22 = vld [vmem:[%s3789_s6 + $0x8] sm:$0xff]   ;;  %v2887_v24 = vld [vmem:[%s3789_s6 + $0x50] sm:$0xff]   ;;  %v2895_v32 = vld [vmem:[%s3789_s6 + $0x60] sm:$0xff]  }
  0x1c   :  { %2561 = vmatpush3.bf16.msra.mxu0 %v2841_v26  ;;  %v2886_v23 = vld [vmem:[%s3789_s6 + $0x88] sm:$0xff]   ;;  %v2888_v25 = vld [vmem:[%s3789_s6 + $0xd0] sm:$0xff]   ;;  %v2896_v33 = vld [vmem:[%s3789_s6 + $0xe0] sm:$0xff]  }
  0x1d   :  { %2583 = vmatpush3.bf16.msra.mxu1 %v2842_v27  ;;  %2562 = vmatprep.subr.bf16.mxu0 %v2843_v28  ;;  %v2889_v26 = vld [vmem:[%s3789_s6 + $0x10] sm:$0xff]   ;;  %v2891_v28 = vld [vmem:[%s3789_s6 + $0x58] sm:$0xff]   ;;  %v2897_v34 = vld [vmem:[%s3789_s6 + $0x20] sm:$0xff]  }
  0x1e   :  { %2584 = vmatprep.subr.bf16.mxu1 %v2844_v29  ;;  %v2890_v27 = vld [vmem:[%s3789_s6 + $0x90] sm:$0xff]   ;;  %v2892_v29 = vld [vmem:[%s3789_s6 + $0xd8] sm:$0xff]   ;;  %v2899_v36 = vld [vmem:[%s3789_s6 + $0x68] sm:$0xff]  }
  0x1f   :  { %v2900_v37 = vld [vmem:[%s3789_s6 + $0xe8] sm:$0xff]   ;;  %v2927_v8 = vld [vmem:[%s3789_s6 + $0x160] sm:$0xff]  }
  0x20   :  { %2563 = vmatpush3.bf16.msra.mxu0 %v2845_v30  ;;  %v2893_v30 = vld [vmem:[%s3789_s6 + $0x18] sm:$0xff]   ;;  %v2902_v39 = vld [vmem:[%s3789_s6 + $0xa8] sm:$0xff]   ;;  %v2928_v9 = vld [vmem:[%s3789_s6 + $0x1e0] sm:$0xff]  }
  0x21   :  { %2585 = vmatpush3.bf16.msra.mxu1 %v2846_v31  ;;  %2592 = vmatprep.subr.bf16.mxu0 %v2847_v40  ;;  %v2894_v31 = vld [vmem:[%s3789_s6 + $0x98] sm:$0xff]   ;;  %v2903_v40 = vld [vmem:[%s3789_s6 + $0x70] sm:$0xff]   ;;  %v2931_v12 = vld [vmem:[%s3789_s6 + $0x168] sm:$0xff]  }
  0x22   :  { %2614 = vmatprep.subr.bf16.mxu1 %v2848_v41  ;;  %v2904_v41 = vld [vmem:[%s3789_s6 + $0xf0] sm:$0xff]   ;;  %v2932_v13 = vld [vmem:[%s3789_s6 + $0x1e8] sm:$0xff]  }
  0x23   :  { %637 = vmatmul.mubr.bf16.vlgmr.msra.gmra.mrb[0].mxu0 %v2327_v35  ;;  %v2898_v35 = vld [vmem:[%s3789_s6 + $0xa0] sm:$0xff]  }
  0x24   :  { %678 = vmatmul.mubr.bf16.vlgmr.msra.gmra.mrb[0].mxu1 %v2329_v38  ;;  %2593 = vmatpush3.bf16.msra.mxu0 %v2849_v42  ;;  %v2901_v38 = vld [vmem:[%s3789_s6 + $0x28] sm:$0xff]   ;;  %v2905_v42 = vld [vmem:[%s3789_s6 + $0x30] sm:$0xff]  }
  0x25   :  { %2615 = vmatpush3.bf16.msra.mxu1 %v2850_v43  ;;  %2594 = vmatprep.subr.bf16.mxu0 %v2851_v44  ;;  %v2906_v43 = vld [vmem:[%s3789_s6 + $0xb0] sm:$0xff]   ;;  %v2907_v44 = vld [vmem:[%s3789_s6 + $0x78] sm:$0xff]  }
  0x26   :  { %2616 = vmatprep.subr.bf16.mxu1 %v2852_v45  ;;  %718 = vmatprep.mubr.bf16.mxu0 %v2332_v11  ;;  %v2908_v45 = vld [vmem:[%s3789_s6 + $0xf8] sm:$0xff]   ;;  %v2930_v11 = vld [vmem:[%s3789_s6 + $0x1a0] sm:$0xff]  }
  0x27   :  { %759 = vmatprep.mubr.bf16.mxu1 %v2334_v15  ;;  %v2934_v15 = vld [vmem:[%s3789_s6 + $0x1a8] sm:$0xff]  }
  0x28   :  { %2595 = vmatpush3.bf16.msra.mxu0 %v2853_v46  ;;  %v2909_v46 = vld [vmem:[%s3789_s6 + $0x38] sm:$0xff]  }
  0x29   :  { %2617 = vmatpush3.bf16.msra.mxu1 %v2854_v47  ;;  %2596 = vmatprep.subr.bf16.mxu0 %v2855_v48  ;;  %v2910_v47 = vld [vmem:[%s3789_s6 + $0xb8] sm:$0xff]   ;;  %v809_v48 = vld [vmem:[%s3784_s1] sm:$0xff] }
  0x2a   :  { %2618 = vmatprep.subr.bf16.mxu1 %v2856_v49  ;;  %v817_v49 = vld [vmem:[%s3784_s1 + $0x40] sm:$0xff] }
  0x2c   :  { %2597 = vmatpush3.bf16.msra.mxu0 %v2857_v50  ;;  %v810_v50 = vld [vmem:[%s3784_s1 + $0x8] sm:$0xff] }
  0x2d   :  { %2619 = vmatpush3.bf16.msra.mxu1 %v2858_v51  ;;  %2598 = vmatprep.subr.bf16.mxu0 %v2859_v52  ;;  %v818_v51 = vld [vmem:[%s3784_s1 + $0x48] sm:$0xff]  ;;  %v2402_v52 = vcombine.low %v809_v48, %v817_v49 }
  0x2e   :  { %2620 = vmatprep.subr.bf16.mxu1 %v2860_v53  ;;  %v2403_v53 = vcombine.high %v809_v48, %v817_v49  ;;  %v2959_v48 = vld [vmem:[%s3789_s6 + $0x260] sm:$0xff]  }
  0x2f   :  { %v2960_v49 = vld [vmem:[%s3789_s6 + $0x2e0] sm:$0xff]  }
  0x30   :  { %2599 = vmatpush3.bf16.msra.mxu0 %v2861_v54  ;;  %v2404_v54 = vcombine.low %v810_v50, %v818_v51 }
  0x31   :  { %2621 = vmatpush3.bf16.msra.mxu1 %v2862_v55  ;;  %2600 = vmatprep.subr.bf16.mxu0 %v2863_v56  ;;  %v2405_v55 = vcombine.high %v810_v50, %v818_v51  ;;  %v2911_v56 = vld [vmem:[%s3789_s6 + $0x140] sm:$0xff]  }
  0x32   :  { %2622 = vmatprep.subr.bf16.mxu1 %v2864_v57  ;;  %v2912_v57 = vld [vmem:[%s3789_s6 + $0x1c0] sm:$0xff]  }
  0x33   :  { %v2961_v50 = vld [vmem:[%s3789_s6 + $0x220] sm:$0xff]  }
  0x34   :  { %2601 = vmatpush3.bf16.msra.mxu0 %v2865_v58  ;;  %v2913_v58 = vld [vmem:[%s3789_s6 + $0x100] sm:$0xff]  }
  0x35   :  { %2623 = vmatpush3.bf16.msra.mxu1 %v2866_v59  ;;  %2602 = vmatprep.subr.bf16.mxu0 %v2867_v60  ;;  %v2914_v59 = vld [vmem:[%s3789_s6 + $0x180] sm:$0xff]   ;;  %v2915_v60 = vld [vmem:[%s3789_s6 + $0x148] sm:$0xff]  }
  0x36   :  { %2624 = vmatprep.subr.bf16.mxu1 %v2868_v61  ;;  %v2916_v61 = vld [vmem:[%s3789_s6 + $0x1c8] sm:$0xff]   ;;  %v2962_v51 = vld [vmem:[%s3789_s6 + $0x2a0] sm:$0xff]  }
  0x38   :  { %2603 = vmatpush3.bf16.msra.mxu0 %v2869_v62  ;;  %v2917_v62 = vld [vmem:[%s3789_s6 + $0x108] sm:$0xff]  }
  0x39   :  { %2625 = vmatpush3.bf16.msra.mxu1 %v2870_v63  ;;  %2604 = vmatprep.subr.bf16.mxu0 %v2871_v0  ;;  %v2918_v63 = vld [vmem:[%s3789_s6 + $0x188] sm:$0xff]   ;;  %v2919_v0 = vld [vmem:[%s3789_s6 + $0x150] sm:$0xff]  }
  0x3a   :  { %2626 = vmatprep.subr.bf16.mxu1 %v2872_v1  ;;  %v2920_v1 = vld [vmem:[%s3789_s6 + $0x1d0] sm:$0xff]  }
  0x3c   :  { %2605 = vmatpush3.bf16.msra.mxu0 %v2873_v2  ;;  %v2921_v2 = vld [vmem:[%s3789_s6 + $0x110] sm:$0xff]  }
  0x3d   :  { %2627 = vmatpush3.bf16.msra.mxu1 %v2874_v3  ;;  %2606 = vmatprep.subr.bf16.mxu0 %v2875_v4  ;;  %v2922_v3 = vld [vmem:[%s3789_s6 + $0x190] sm:$0xff]   ;;  %v2923_v4 = vld [vmem:[%s3789_s6 + $0x158] sm:$0xff]  }
  0x3e   :  { %2628 = vmatprep.subr.bf16.mxu1 %v2876_v5  ;;  %v2924_v5 = vld [vmem:[%s3789_s6 + $0x1d8] sm:$0xff]  }
  0x40   :  { %2607 = vmatpush3.bf16.msra.mxu0 %v2877_v6  ;;  %v2925_v6 = vld [vmem:[%s3789_s6 + $0x118] sm:$0xff]  }
  0x41   :  { %2629 = vmatpush3.bf16.msra.mxu1 %v2878_v7  ;;  %2636 = vmatprep.subr.bf16.mxu0 %v2879_v16  ;;  %v2926_v7 = vld [vmem:[%s3789_s6 + $0x198] sm:$0xff]   ;;  %v2935_v16 = vld [vmem:[%s3789_s6 + $0x170] sm:$0xff]  }
  0x42   :  { %2658 = vmatprep.subr.bf16.mxu1 %v2880_v17  ;;  %v2936_v17 = vld [vmem:[%s3789_s6 + $0x1f0] sm:$0xff]  }
  0x43   :  { %719 = vmatmul.mubr.bf16.vlgmr.msra.gmra.mrb[4].mxu0 %v2331_v10  ;;  %v2929_v10 = vld [vmem:[%s3789_s6 + $0x120] sm:$0xff]  }
  0x44   :  { %760 = vmatmul.mubr.bf16.vlgmr.msra.gmra.mrb[4].mxu1 %v2333_v14  ;;  %2637 = vmatpush3.bf16.msra.mxu0 %v2881_v18  ;;  %v2933_v14 = vld [vmem:[%s3789_s6 + $0x128] sm:$0xff]   ;;  %v2937_v18 = vld [vmem:[%s3789_s6 + $0x130] sm:$0xff]  }
  0x45   :  { %2659 = vmatpush3.bf16.msra.mxu1 %v2882_v19  ;;  %2638 = vmatprep.subr.bf16.mxu0 %v2883_v20  ;;  %v2938_v19 = vld [vmem:[%s3789_s6 + $0x1b0] sm:$0xff]   ;;  %v2939_v20 = vld [vmem:[%s3789_s6 + $0x178] sm:$0xff]  }
  0x46   :  { %2660 = vmatprep.subr.bf16.mxu1 %v2884_v21  ;;  %1968 = vmatprep.mubr.bf16.mxu0 %v2403_v53  ;;  %v2940_v21 = vld [vmem:[%s3789_s6 + $0x1f8] sm:$0xff]   ;;  %v2964_v53 = vld [vmem:[%s3789_s6 + $0x2e8] sm:$0xff]  }
  0x47   :  { %2009 = vmatprep.mubr.bf16.mxu1 %v2405_v55  ;;  %v2966_v55 = vld [vmem:[%s3789_s6 + $0x2a8] sm:$0xff]  }
  0x48   :  { %2639 = vmatpush3.bf16.msra.mxu0 %v2885_v22  ;;  %v2941_v22 = vld [vmem:[%s3789_s6 + $0x138] sm:$0xff]  }
  0x49   :  { %2661 = vmatpush3.bf16.msra.mxu1 %v2886_v23  ;;  %2640 = vmatprep.subr.bf16.mxu0 %v2887_v24  ;;  %v2942_v23 = vld [vmem:[%s3789_s6 + $0x1b8] sm:$0xff]   ;;  %v811_v24 = vld [vmem:[%s3784_s1 + $0x10] sm:$0xff] }
  0x4a   :  { %2662 = vmatprep.subr.bf16.mxu1 %v2888_v25  ;;  %v819_v25 = vld [vmem:[%s3784_s1 + $0x50] sm:$0xff] }
  0x4c   :  { %2641 = vmatpush3.bf16.msra.mxu0 %v2889_v26  ;;  %v812_v26 = vld [vmem:[%s3784_s1 + $0x18] sm:$0xff] }
  0x4d   :  { %2663 = vmatpush3.bf16.msra.mxu1 %v2890_v27  ;;  %2642 = vmatprep.subr.bf16.mxu0 %v2891_v28  ;;  %v2406_v27 = vcombine.low %v811_v24, %v819_v25  ;;  %v2407_v28 = vcombine.high %v811_v24, %v819_v25  ;;  %v2991_v24 = vld [vmem:[%s3789_s6 + $0x360] sm:$0xff]  }
  0x4e   :  { %2664 = vmatprep.subr.bf16.mxu1 %v2892_v29  ;;  %v820_v29 = vld [vmem:[%s3784_s1 + $0x58] sm:$0xff]  ;;  %v2992_v25 = vld [vmem:[%s3789_s6 + $0x3e0] sm:$0xff]  }
  0x50   :  { %2643 = vmatpush3.bf16.msra.mxu0 %v2893_v30  ;;  %v2408_v30 = vcombine.low %v812_v26, %v820_v29 }
  0x51   :  { %2665 = vmatpush3.bf16.msra.mxu1 %v2894_v31  ;;  %2644 = vmatprep.subr.bf16.mxu0 %v2895_v32  ;;  %v2409_v31 = vcombine.high %v812_v26, %v820_v29  ;;  %v2943_v32 = vld [vmem:[%s3789_s6 + $0x240] sm:$0xff]   ;;  %v2996_v29 = vld [vmem:[%s3789_s6 + $0x3e8] sm:$0xff]  }
  0x52   :  { %2666 = vmatprep.subr.bf16.mxu1 %v2896_v33  ;;  %v2944_v33 = vld [vmem:[%s3789_s6 + $0x2c0] sm:$0xff]  }
  0x53   :  { %v2993_v26 = vld [vmem:[%s3789_s6 + $0x320] sm:$0xff]  }
  0x54   :  { %2645 = vmatpush3.bf16.msra.mxu0 %v2897_v34  ;;  %v2945_v34 = vld [vmem:[%s3789_s6 + $0x200] sm:$0xff]  }
  0x55   :  { %2667 = vmatpush3.bf16.msra.mxu1 %v2898_v35  ;;  %2646 = vmatprep.subr.bf16.mxu0 %v2899_v36  ;;  %v2946_v35 = vld [vmem:[%s3789_s6 + $0x280] sm:$0xff]   ;;  %v2947_v36 = vld [vmem:[%s3789_s6 + $0x248] sm:$0xff]  }
  0x56   :  { %2668 = vmatprep.subr.bf16.mxu1 %v2900_v37  ;;  %v2948_v37 = vld [vmem:[%s3789_s6 + $0x2c8] sm:$0xff]  }
  0x58   :  { %2647 = vmatpush3.bf16.msra.mxu0 %v2901_v38  ;;  %v2949_v38 = vld [vmem:[%s3789_s6 + $0x208] sm:$0xff]  }
  0x59   :  { %2669 = vmatpush3.bf16.msra.mxu1 %v2902_v39  ;;  %2648 = vmatprep.subr.bf16.mxu0 %v2903_v40  ;;  %v2950_v39 = vld [vmem:[%s3789_s6 + $0x288] sm:$0xff]   ;;  %v2951_v40 = vld [vmem:[%s3789_s6 + $0x250] sm:$0xff]  }
  0x5a   :  { %2670 = vmatprep.subr.bf16.mxu1 %v2904_v41  ;;  %v2952_v41 = vld [vmem:[%s3789_s6 + $0x2d0] sm:$0xff]  }
  0x5c   :  { %2649 = vmatpush3.bf16.msra.mxu0 %v2905_v42  ;;  %v2953_v42 = vld [vmem:[%s3789_s6 + $0x210] sm:$0xff]  }
  0x5d   :  { %2671 = vmatpush3.bf16.msra.mxu1 %v2906_v43  ;;  %2650 = vmatprep.subr.bf16.mxu0 %v2907_v44  ;;  %v2954_v43 = vld [vmem:[%s3789_s6 + $0x290] sm:$0xff]   ;;  %v2955_v44 = vld [vmem:[%s3789_s6 + $0x258] sm:$0xff]  }
  0x5e   :  { %2672 = vmatprep.subr.bf16.mxu1 %v2908_v45  ;;  %v2956_v45 = vld [vmem:[%s3789_s6 + $0x2d8] sm:$0xff]  }
  0x60   :  { %2651 = vmatpush3.bf16.msra.mxu0 %v2909_v46  ;;  %v2957_v46 = vld [vmem:[%s3789_s6 + $0x218] sm:$0xff]  }
  0x61   :  { %2673 = vmatpush3.bf16.msra.mxu1 %v2910_v47  ;;  %2680 = vmatprep.subr.bf16.mxu0 %v2911_v56  ;;  %v2958_v47 = vld [vmem:[%s3789_s6 + $0x298] sm:$0xff]   ;;  %v2967_v56 = vld [vmem:[%s3789_s6 + $0x270] sm:$0xff]  }
  0x62   :  { %2702 = vmatprep.subr.bf16.mxu1 %v2912_v57  ;;  %v2968_v57 = vld [vmem:[%s3789_s6 + $0x2f0] sm:$0xff]  }
  0x63   :  { %1969 = vmatmul.mubr.bf16.vlgmr.msra.gmra.mrb[8].mxu0 %v2402_v52  ;;  %v2963_v52 = vld [vmem:[%s3789_s6 + $0x268] sm:$0xff]  }
  0x64   :  { %2010 = vmatmul.mubr.bf16.vlgmr.msra.gmra.mrb[8].mxu1 %v2404_v54  ;;  %2681 = vmatpush3.bf16.msra.mxu0 %v2913_v58  ;;  %v2965_v54 = vld [vmem:[%s3789_s6 + $0x228] sm:$0xff]   ;;  %v2969_v58 = vld [vmem:[%s3789_s6 + $0x230] sm:$0xff]  }
  0x65   :  { %2703 = vmatpush3.bf16.msra.mxu1 %v2914_v59  ;;  %2682 = vmatprep.subr.bf16.mxu0 %v2915_v60  ;;  %v2970_v59 = vld [vmem:[%s3789_s6 + $0x2b0] sm:$0xff]   ;;  %v2971_v60 = vld [vmem:[%s3789_s6 + $0x278] sm:$0xff]  }
  0x66   :  { %2704 = vmatprep.subr.bf16.mxu1 %v2916_v61  ;;  %2050 = vmatprep.mubr.bf16.mxu0 %v2407_v28  ;;  %v2972_v61 = vld [vmem:[%s3789_s6 + $0x2f8] sm:$0xff]   ;;  %v2995_v28 = vld [vmem:[%s3789_s6 + $0x368] sm:$0xff]  }
  0x67   :  { %2091 = vmatprep.mubr.bf16.mxu1 %v2409_v31  ;;  %v2998_v31 = vld [vmem:[%s3789_s6 + $0x3a8] sm:$0xff]  }
  0x68   :  { %2683 = vmatpush3.bf16.msra.mxu0 %v2917_v62  ;;  %v2973_v62 = vld [vmem:[%s3789_s6 + $0x238] sm:$0xff]  }
  0x69   :  { %2705 = vmatpush3.bf16.msra.mxu1 %v2918_v63  ;;  %2684 = vmatprep.subr.bf16.mxu0 %v2919_v0  ;;  %v2974_v63 = vld [vmem:[%s3789_s6 + $0x2b8] sm:$0xff]   ;;  %v813_v0 = vld [vmem:[%s3784_s1 + $0x20] sm:$0xff] }
  0x6a   :  { %2706 = vmatprep.subr.bf16.mxu1 %v2920_v1  ;;  %v821_v1 = vld [vmem:[%s3784_s1 + $0x60] sm:$0xff] }
  0x6c   :  { %2685 = vmatpush3.bf16.msra.mxu0 %v2921_v2  ;;  %v2410_v2 = vcombine.low %v813_v0, %v821_v1 }
  0x6d   :  { %2707 = vmatpush3.bf16.msra.mxu1 %v2922_v3  ;;  %2686 = vmatprep.subr.bf16.mxu0 %v2923_v4  ;;  %v2411_v3 = vcombine.high %v813_v0, %v821_v1  ;;  %v814_v4 = vld [vmem:[%s3784_s1 + $0x28] sm:$0xff] }
  0x6e   :  { %2708 = vmatprep.subr.bf16.mxu1 %v2924_v5  ;;  %v822_v5 = vld [vmem:[%s3784_s1 + $0x68] sm:$0xff] }
  0x70   :  { %2687 = vmatpush3.bf16.msra.mxu0 %v2925_v6  ;;  %v2412_v6 = vcombine.low %v814_v4, %v822_v5 }
  0x71   :  { %2709 = vmatpush3.bf16.msra.mxu1 %v2926_v7  ;;  %2688 = vmatprep.subr.bf16.mxu0 %v2927_v8  ;;  %v2413_v7 = vcombine.high %v814_v4, %v822_v5  ;;  %v2975_v8 = vld [vmem:[%s3789_s6 + $0x340] sm:$0xff]  }
  0x72   :  { %2710 = vmatprep.subr.bf16.mxu1 %v2928_v9  ;;  %v2976_v9 = vld [vmem:[%s3789_s6 + $0x3c0] sm:$0xff]  }
  0x74   :  { %2689 = vmatpush3.bf16.msra.mxu0 %v2929_v10  ;;  %v2977_v10 = vld [vmem:[%s3789_s6 + $0x300] sm:$0xff]  }
  0x75   :  { %2711 = vmatpush3.bf16.msra.mxu1 %v2930_v11  ;;  %2690 = vmatprep.subr.bf16.mxu0 %v2931_v12  ;;  %v2978_v11 = vld [vmem:[%s3789_s6 + $0x380] sm:$0xff]   ;;  %v2979_v12 = vld [vmem:[%s3789_s6 + $0x348] sm:$0xff]  }
  0x76   :  { %2712 = vmatprep.subr.bf16.mxu1 %v2932_v13  ;;  %v2980_v13 = vld [vmem:[%s3789_s6 + $0x3c8] sm:$0xff]  }
  0x78   :  { %2691 = vmatpush3.bf16.msra.mxu0 %v2933_v14  ;;  %v2981_v14 = vld [vmem:[%s3789_s6 + $0x308] sm:$0xff]  }
  0x79   :  { %2713 = vmatpush3.bf16.msra.mxu1 %v2934_v15  ;;  %2692 = vmatprep.subr.bf16.mxu0 %v2935_v16  ;;  %v2982_v15 = vld [vmem:[%s3789_s6 + $0x388] sm:$0xff]   ;;  %v2983_v16 = vld [vmem:[%s3789_s6 + $0x350] sm:$0xff]  }
  0x7a   :  { %2714 = vmatprep.subr.bf16.mxu1 %v2936_v17  ;;  %v2984_v17 = vld [vmem:[%s3789_s6 + $0x3d0] sm:$0xff]  }
  0x7c   :  { %2693 = vmatpush3.bf16.msra.mxu0 %v2937_v18  ;;  %v2985_v18 = vld [vmem:[%s3789_s6 + $0x310] sm:$0xff]  }
  0x7d   :  { %2715 = vmatpush3.bf16.msra.mxu1 %v2938_v19  ;;  %2694 = vmatprep.subr.bf16.mxu0 %v2939_v20  ;;  %v2986_v19 = vld [vmem:[%s3789_s6 + $0x390] sm:$0xff]   ;;  %v2987_v20 = vld [vmem:[%s3789_s6 + $0x358] sm:$0xff]  }
  0x7e   :  { %2716 = vmatprep.subr.bf16.mxu1 %v2940_v21  ;;  %v2988_v21 = vld [vmem:[%s3789_s6 + $0x3d8] sm:$0xff]  }
  0x80   :  { %2695 = vmatpush3.bf16.msra.mxu0 %v2941_v22  ;;  %v2989_v22 = vld [vmem:[%s3789_s6 + $0x318] sm:$0xff]  }
  0x81   :  { %2717 = vmatpush3.bf16.msra.mxu1 %v2942_v23  ;;  %2724 = vmatprep.subr.bf16.mxu0 %v2943_v32  ;;  %v2990_v23 = vld [vmem:[%s3789_s6 + $0x398] sm:$0xff]   ;;  %v2999_v32 = vld [vmem:[%s3789_s6 + $0x370] sm:$0xff]  }
  0x82   :  { %2746 = vmatprep.subr.bf16.mxu1 %v2944_v33  ;;  %v3000_v33 = vld [vmem:[%s3789_s6 + $0x3f0] sm:$0xff]  }
  0x83   :  { %2051 = vmatmul.mubr.bf16.vlgmr.msra.gmra.mrb[12].mxu0 %v2406_v27  ;;  %v2994_v27 = vld [vmem:[%s3789_s6 + $0x3a0] sm:$0xff]  }
  0x84   :  { %2092 = vmatmul.mubr.bf16.vlgmr.msra.gmra.mrb[12].mxu1 %v2408_v30  ;;  %2725 = vmatpush3.bf16.msra.mxu0 %v2945_v34  ;;  %v2997_v30 = vld [vmem:[%s3789_s6 + $0x328] sm:$0xff]   ;;  %v3001_v34 = vld [vmem:[%s3789_s6 + $0x330] sm:$0xff]  }
  0x85   :  { %2747 = vmatpush3.bf16.msra.mxu1 %v2946_v35  ;;  %2726 = vmatprep.subr.bf16.mxu0 %v2947_v36  ;;  %v3002_v35 = vld [vmem:[%s3789_s6 + $0x3b0] sm:$0xff]   ;;  %v3003_v36 = vld [vmem:[%s3789_s6 + $0x378] sm:$0xff]  }
  0x86   :  { %2748 = vmatprep.subr.bf16.mxu1 %v2948_v37  ;;  %2132 = vmatprep.mubr.bf16.mxu0 %v2411_v3  ;;  %v3004_v37 = vld [vmem:[%s3789_s6 + $0x3f8] sm:$0xff]  }
  0x87   :  { %2173 = vmatprep.mubr.bf16.mxu1 %v2413_v7 }
  0x88   :  { %2727 = vmatpush3.bf16.msra.mxu0 %v2949_v38  ;;  %v3005_v38 = vld [vmem:[%s3789_s6 + $0x338] sm:$0xff]  }
  0x89   :  { %2749 = vmatpush3.bf16.msra.mxu1 %v2950_v39  ;;  %2728 = vmatprep.subr.bf16.mxu0 %v2951_v40  ;;  %v3006_v39 = vld [vmem:[%s3789_s6 + $0x3b8] sm:$0xff]   ;;  %v815_v40 = vld [vmem:[%s3784_s1 + $0x30] sm:$0xff] }
  0x8a   :  { %2750 = vmatprep.subr.bf16.mxu1 %v2952_v41  ;;  %v823_v41 = vld [vmem:[%s3784_s1 + $0x70] sm:$0xff] }
  0x8c   :  { %2729 = vmatpush3.bf16.msra.mxu0 %v2953_v42  ;;  %v816_v42 = vld [vmem:[%s3784_s1 + $0x38] sm:$0xff] }
  0x8d   :  { %2751 = vmatpush3.bf16.msra.mxu1 %v2954_v43  ;;  %2730 = vmatprep.subr.bf16.mxu0 %v2955_v44  ;;  %v824_v43 = vld [vmem:[%s3784_s1 + $0x78] sm:$0xff]  ;;  %v2414_v44 = vcombine.low %v815_v40, %v823_v41 }
  0x8e   :  { %2752 = vmatprep.subr.bf16.mxu1 %v2956_v45  ;;  %v2415_v45 = vcombine.high %v815_v40, %v823_v41 }
  0x90   :  { %2731 = vmatpush3.bf16.msra.mxu0 %v2957_v46  ;;  %v2416_v46 = vcombine.low %v816_v42, %v824_v43 }
  0x91   :  { %2753 = vmatpush3.bf16.msra.mxu1 %v2958_v47  ;;  %2732 = vmatprep.subr.bf16.mxu0 %v2959_v48  ;;  %v2417_v47 = vcombine.high %v816_v42, %v824_v43 }
  0x92   :  { %2754 = vmatprep.subr.bf16.mxu1 %v2960_v49 }
  0x94   :  { %2733 = vmatpush3.bf16.msra.mxu0 %v2961_v50 }
  0x95   :  { %2755 = vmatpush3.bf16.msra.mxu1 %v2962_v51  ;;  %2734 = vmatprep.subr.bf16.mxu0 %v2963_v52 }
  0x96   :  { %2756 = vmatprep.subr.bf16.mxu1 %v2964_v53 }
  0x98   :  { %2735 = vmatpush3.bf16.msra.mxu0 %v2965_v54 }
  0x99   :  { %2757 = vmatpush3.bf16.msra.mxu1 %v2966_v55  ;;  %2736 = vmatprep.subr.bf16.mxu0 %v2967_v56 }
  0x9a   :  { %2758 = vmatprep.subr.bf16.mxu1 %v2968_v57 }
  0x9c   :  { %2737 = vmatpush3.bf16.msra.mxu0 %v2969_v58 }
  0x9d   :  { %2759 = vmatpush3.bf16.msra.mxu1 %v2970_v59  ;;  %2738 = vmatprep.subr.bf16.mxu0 %v2971_v60 }
  0x9e   :  { %2760 = vmatprep.subr.bf16.mxu1 %v2972_v61 }
  0xa0   :  { %2739 = vmatpush3.bf16.msra.mxu0 %v2973_v62 }
  0xa1   :  { %2761 = vmatpush3.bf16.msra.mxu1 %v2974_v63  ;;  %2768 = vmatprep.subr.bf16.mxu0 %v2975_v8 }
  0xa2   :  { %2790 = vmatprep.subr.bf16.mxu1 %v2976_v9 }
  0xa3   :  { %2133 = vmatmul.mubr.bf16.vlgmr.msra.gmra.mrb[16].mxu0 %v2410_v2 }
  0xa4   :  { %2174 = vmatmul.mubr.bf16.vlgmr.msra.gmra.mrb[16].mxu1 %v2412_v6  ;;  %2769 = vmatpush3.bf16.msra.mxu0 %v2977_v10 }
  0xa5   :  { %2791 = vmatpush3.bf16.msra.mxu1 %v2978_v11  ;;  %2770 = vmatprep.subr.bf16.mxu0 %v2979_v12 }
  0xa6   :  { %2792 = vmatprep.subr.bf16.mxu1 %v2980_v13 }
  0xa8   :  { %2771 = vmatpush3.bf16.msra.mxu0 %v2981_v14 }
  0xa9   :  { %2793 = vmatpush3.bf16.msra.mxu1 %v2982_v15  ;;  %2772 = vmatprep.subr.bf16.mxu0 %v2983_v16 }
  0xaa   :  { %2794 = vmatprep.subr.bf16.mxu1 %v2984_v17 }
  0xac   :  { %2773 = vmatpush3.bf16.msra.mxu0 %v2985_v18 }
  0xad   :  { %2795 = vmatpush3.bf16.msra.mxu1 %v2986_v19  ;;  %2774 = vmatprep.subr.bf16.mxu0 %v2987_v20 }
  0xae   :  { %2796 = vmatprep.subr.bf16.mxu1 %v2988_v21 }
  0xb0   :  { %2775 = vmatpush3.bf16.msra.mxu0 %v2989_v22 }
  0xb1   :  { %2797 = vmatpush3.bf16.msra.mxu1 %v2990_v23  ;;  %2776 = vmatprep.subr.bf16.mxu0 %v2991_v24 }
  0xb2   :  { %2798 = vmatprep.subr.bf16.mxu1 %v2992_v25 }
  0xb4   :  { %2777 = vmatpush3.bf16.msra.mxu0 %v2993_v26 }
  0xb5   :  { %2799 = vmatpush3.bf16.msra.mxu1 %v2994_v27  ;;  %2778 = vmatprep.subr.bf16.mxu0 %v2995_v28 }
  0xb6   :  { %2800 = vmatprep.subr.bf16.mxu1 %v2996_v29 }
  0xb8   :  { %2779 = vmatpush3.bf16.msra.mxu0 %v2997_v30 }
  0xb9   :  { %2801 = vmatpush3.bf16.msra.mxu1 %v2998_v31  ;;  %2780 = vmatprep.subr.bf16.mxu0 %v2999_v32 }
  0xba   :  { %2802 = vmatprep.subr.bf16.mxu1 %v3000_v33 }
  0xbc   :  { %2781 = vmatpush3.bf16.msra.mxu0 %v3001_v34 }
  0xbd   :  { %2803 = vmatpush3.bf16.msra.mxu1 %v3002_v35  ;;  %2782 = vmatprep.subr.bf16.mxu0 %v3003_v36 }
  0xbe   :  { %2804 = vmatprep.subr.bf16.mxu1 %v3004_v37 }
  0xc0   :  { %2783 = vmatpush3.bf16.msra.mxu0 %v3005_v38 }
  0xc1   :  { %2805 = vmatpush3.bf16.msra.mxu1 %v3006_v39 }
  0xc2   :  { %15 = vsyncpa [#allocation3], 0  ;;  %2214 = vmatprep.mubr.bf16.mxu0 %v2415_v45  ;;  %2255 = vmatprep.mubr.bf16.mxu1 %v2417_v47  ;;  %v2326_v50 = vld [vmem:[%s3786_s3] ss:$0 sm:$0xff] }
  0xc3   :  { %2215 = vmatmul.mubr.bf16.vlgmr.msra.gmra.mrb[20].mxu0 %v2414_v44  ;;  %v2401_v19 = vld [vmem:[%s3790_s7] ss:$0 sm:$0xff] }
  0xc4   :  { %2256 = vmatmul.mubr.bf16.vlgmr.msra.gmra.mrb[20].mxu1 %v2416_v46 }
  0xf6   :  { %v2564_v48 = vpop.f32.mrb[0].mxu0 }
  0xf7   :  { %v2586_v49 = vpop.f32.mrb[0].mxu1  ;;  %v2565_v51 = vpop.f32.mrb[1].mxu0 }
  0xf8   :  { %v2566_v52 = vadd.f32 %v2565_v51, %v2564_v48  ;;  %v2587_v53 = vpop.f32.mrb[1].mxu1  ;;  %v2567_v54 = vpop.f32.mrb[2].mxu0 }
  0xf9   :  { %v2588_v55 = vadd.f32 %v2587_v53, %v2586_v49  ;;  %v2589_v56 = vpop.f32.mrb[2].mxu1  ;;  %v2568_v57 = vpop.f32.mrb[3].mxu0 }
  0xfa   :  { %v639_v58 = vadd.f32 %v2566_v52, %v2326_v50  ;;  %v2569_v59 = vadd.f32 %v2568_v57, %v2567_v54  ;;  %v2590_v60 = vpop.f32.mrb[3].mxu1 }
  0xfb   :  { %v2591_v61 = vadd.f32 %v2590_v60, %v2589_v56 }
  0xfc   :  { %v680_v62 = vadd.f32 %v2588_v55, %v639_v58  ;;  %v642_v63 = vadd.f32 %v2569_v59, %v2326_v50 }
  0xfe   :  { %v683_v0 = vadd.f32 %v2591_v61, %v642_v63 }
 0x116   :  { %v2608_v1 = vpop.f32.mrb[4].mxu0 }
 0x117   :  { %v2630_v2 = vpop.f32.mrb[4].mxu1  ;;  %v2609_v3 = vpop.f32.mrb[5].mxu0 }
 0x118   :  { %v2610_v4 = vadd.f32 %v2609_v3, %v2608_v1  ;;  %v2631_v5 = vpop.f32.mrb[5].mxu1  ;;  %v2611_v6 = vpop.f32.mrb[6].mxu0 }
 0x119   :  { %v2632_v7 = vadd.f32 %v2631_v5, %v2630_v2  ;;  %v2633_v8 = vpop.f32.mrb[6].mxu1  ;;  %v2612_v9 = vpop.f32.mrb[7].mxu0 }
 0x11a   :  { %v721_v10 = vadd.f32 %v2610_v4, %v680_v62  ;;  %v2613_v11 = vadd.f32 %v2612_v9, %v2611_v6  ;;  %v2634_v12 = vpop.f32.mrb[7].mxu1 }
 0x11b   :  { %v2635_v13 = vadd.f32 %v2634_v12, %v2633_v8 }
 0x11c   :  { %v724_v14 = vadd.f32 %v2613_v11, %v683_v0  ;;  %v3748_v15 = vadd.f32 %v2632_v7, %v721_v10 }
 0x11e   :  { %770 = vadd.xlane.f32.xlu0 %v3748_v15  ;;  %v3751_v16 = vadd.f32 %v2635_v13, %v724_v14 }
 0x122   :  { %772 = vadd.xlane.f32.xlu0 %v3751_v16 }
 0x136   :  { %v2652_v17 = vpop.f32.mrb[8].mxu0 }
 0x137   :  { %v2674_v18 = vpop.f32.mrb[8].mxu1  ;;  %v2653_v20 = vpop.f32.mrb[9].mxu0 }
 0x138   :  { %v2675_v21 = vpop.f32.mrb[9].mxu1  ;;  %v2654_v22 = vadd.f32 %v2653_v20, %v2652_v17  ;;  %v2655_v24 = vpop.f32.mrb[10].mxu0 }
 0x139   :  { %v2676_v23 = vadd.f32 %v2675_v21, %v2674_v18  ;;  %v2677_v25 = vpop.f32.mrb[10].mxu1  ;;  %v2656_v26 = vpop.f32.mrb[11].mxu0 }
 0x13a   :  { %v2678_v27 = vpop.f32.mrb[11].mxu1  ;;  %v1971_v28 = vadd.f32 %v2654_v22, %v2401_v19  ;;  %v2657_v29 = vadd.f32 %v2656_v26, %v2655_v24 }
 0x13b   :  { %v2679_v30 = vadd.f32 %v2678_v27, %v2677_v25 }
 0x13c   :  { %v2012_v31 = vadd.f32 %v2676_v23, %v1971_v28  ;;  %v1974_v32 = vadd.f32 %v2657_v29, %v2401_v19 }
 0x13e   :  { %v2015_v33 = vadd.f32 %v2679_v30, %v1974_v32 }
 0x156   :  { %v2696_v34 = vpop.f32.mrb[12].mxu0 }
 0x157   :  { %v2718_v35 = vpop.f32.mrb[12].mxu1  ;;  %v2697_v36 = vpop.f32.mrb[13].mxu0 }
 0x158   :  { %v2698_v37 = vadd.f32 %v2697_v36, %v2696_v34  ;;  %v2719_v38 = vpop.f32.mrb[13].mxu1  ;;  %v2699_v39 = vpop.f32.mrb[14].mxu0 }
 0x159   :  { %v2720_v40 = vadd.f32 %v2719_v38, %v2718_v35  ;;  %v2721_v41 = vpop.f32.mrb[14].mxu1  ;;  %v2700_v42 = vpop.f32.mrb[15].mxu0 }
 0x15a   :  { %v2053_v43 = vadd.f32 %v2698_v37, %v2012_v31  ;;  %v2701_v44 = vadd.f32 %v2700_v42, %v2699_v39  ;;  %v2722_v45 = vpop.f32.mrb[15].mxu1 }
 0x15b   :  { %v2723_v46 = vadd.f32 %v2722_v45, %v2721_v41 }
 0x15c   :  { %v2094_v47 = vadd.f32 %v2720_v40, %v2053_v43  ;;  %v2056_v48 = vadd.f32 %v2701_v44, %v2015_v33 }
 0x15e   :  { %v2097_v49 = vadd.f32 %v2723_v46, %v2056_v48 }
 0x176   :  { %v2740_v50 = vpop.f32.mrb[16].mxu0 }
 0x177   :  { %v2762_v51 = vpop.f32.mrb[16].mxu1  ;;  %v2741_v52 = vpop.f32.mrb[17].mxu0 }
 0x178   :  { %v2742_v53 = vadd.f32 %v2741_v52, %v2740_v50  ;;  %v2763_v54 = vpop.f32.mrb[17].mxu1  ;;  %v2743_v55 = vpop.f32.mrb[18].mxu0 }
 0x179   :  { %v2764_v56 = vadd.f32 %v2763_v54, %v2762_v51  ;;  %v2765_v57 = vpop.f32.mrb[18].mxu1  ;;  %v2744_v58 = vpop.f32.mrb[19].mxu0  ;;  %v2546_v51 = vld [vmem:[%s3791_s8] ss:$0 sm:$0xff] }
 0x17a   :  { %v2135_v59 = vadd.f32 %v2742_v53, %v2094_v47  ;;  %v2745_v60 = vadd.f32 %v2744_v58, %v2743_v55  ;;  %v2766_v61 = vpop.f32.mrb[19].mxu1  ;;  %v2400_v55 = vld [vmem:[%s3788_s5] ss:$0 sm:$0xff] }
 0x17b   :  { %v2767_v62 = vadd.f32 %v2766_v61, %v2765_v57 }
 0x17c   :  { %v2176_v63 = vadd.f32 %v2764_v56, %v2135_v59  ;;  %v2138_v0 = vadd.f32 %v2745_v60, %v2097_v49  ;;  %v2399_v49 = vld [vmem:[%s3787_s4] ss:$0 sm:$0xff]  ;;  %s3039_s4 = smov [#allocation2]  }
 0x17d   :  { %v2547_v56 = vld [vmem:[%s3792_s9] ss:$0 sm:$0xff]  ;;  %s2315_s8 = sshll.u32 %s3039_s4, 4  ;;  %s2316_s8 = int_to_ptr.vmem [resolvable:$true] %s2315_s8 }
 0x17e   :  { %v2179_v1 = vadd.f32 %v2767_v62, %v2138_v0  ;;  %s3015_s5 = scalar_lea.vmem %s2316_s8, 256  ;;  %p3020_p1 = scmp.lt.s32.totalorder %s2316_s8, %s2316_s8 }
 0x17f   :  { %p3016_p0 = scmp.ne.s32.totalorder %s2316_s8, %s3015_s5  ;;  %p3021_p2 = scmp.lt.s32.totalorder %s3015_s5, %s3015_s5 }
 0x181   :  { %p3022_p3 = por %p3021_p2, %p3020_p1 }
 0x183   :  { %p3023_p4 = pnand %p3022_p3, %p3016_p0 }
 0x196   :  { %v2784_v2 = vpop.f32.mrb[20].mxu0 }
 0x197   :  { %v2806_v3 = vpop.f32.mrb[20].mxu1  ;;  %v2785_v4 = vpop.f32.mrb[21].mxu0 }
 0x198   :  { %v2807_v5 = vpop.f32.mrb[21].mxu1  ;;  %v2786_v6 = vadd.f32 %v2785_v4, %v2784_v2  ;;  %v2787_v8 = vpop.f32.mrb[22].mxu0 }
 0x199   :  { %v2808_v7 = vadd.f32 %v2807_v5, %v2806_v3  ;;  %v2809_v9 = vpop.f32.mrb[22].mxu1  ;;  %v2788_v10 = vpop.f32.mrb[23].mxu0 }
 0x19a   :  { %v2810_v11 = vpop.f32.mrb[23].mxu1  ;;  %v2217_v12 = vadd.f32 %v2786_v6, %v2176_v63  ;;  %v2789_v13 = vadd.f32 %v2788_v10, %v2787_v8 }
 0x19b   :  { %v2811_v14 = vadd.f32 %v2810_v11, %v2809_v9 }
 0x19c   :  { %v2220_v17 = vadd.f32 %v2789_v13, %v2179_v1  ;;  %v2258_v18 = vadd.f32 %v2808_v7, %v2217_v12 }
 0x19e   :  { %2266 = vadd.xlane.f32.xlu1 %v2258_v18  ;;  %v2261_v19 = vadd.f32 %v2811_v14, %v2220_v17 }
 0x1a2   :  { %2268 = vadd.xlane.f32.xlu1 %v2261_v19 }
 0x1ab   :  { %v771_v20 = vpop.xlane.xlu0 %770 }
 0x1ac   :  { %v775_v21 = vmul.f32 0.0078125, %v771_v20 }
 0x1ae   :  { %v777_v22 = vsub.f32 %v3748_v15, %v775_v21 }
 0x1af   :  { %v773_v23 = vpop.xlane.xlu0 %772 }
 0x1b0   :  { %v776_v24 = vmul.f32 0.0078125, %v773_v23  ;;  %v779_v25 = vmul.f32 %v777_v22, %v777_v22 }
 0x1b2   :  { %v778_v26 = vsub.f32 %v3751_v16, %v776_v24  ;;  %781 = vadd.xlane.f32.xlu0 %v779_v25 }
 0x1b4   :  { %v780_v27 = vmul.f32 %v778_v26, %v778_v26 }
 0x1b6   :  { %783 = vadd.xlane.f32.xlu1 %v780_v27 }
 0x22b   :  { %v2267_v28 = vpop.xlane.xlu1 %2266 }
 0x22c   :  { %v2270_v29 = vmul.f32 0.0078125, %v2267_v28 }
 0x22e   :  { %v2272_v30 = vsub.f32 %v2258_v18, %v2270_v29 }
 0x22f   :  { %v2269_v31 = vpop.xlane.xlu1 %2268 }
 0x230   :  { %v2271_v32 = vmul.f32 0.0078125, %v2269_v31  ;;  %v2274_v33 = vmul.f32 %v2272_v30, %v2272_v30 }
 0x232   :  { %v2273_v34 = vsub.f32 %v2261_v19, %v2271_v32  ;;  %2276 = vadd.xlane.f32.xlu0 %v2274_v33 }
 0x234   :  { %v2275_v35 = vmul.f32 %v2273_v34, %v2273_v34 }
 0x236   :  { %2278 = vadd.xlane.f32.xlu1 %v2275_v35 }
 0x23f   :  { %v782_v36 = vpop.xlane.xlu0 %781 }
 0x240   :  { %v785_v15 = vmul.f32 0.0078125, %v782_v36 }
 0x242   :  { %v787_v38 = vadd.f32 1e-12, %v785_v15 }
 0x243   :  { %v784_v37 = vpop.xlane.xlu1 %783 }
 0x244   :  { %v786_v39 = vmul.f32 0.0078125, %v784_v37  ;;  %3007 = vrsqrt.f32 %v787_v38 }
 0x246   :  { %v788_v16 = vadd.f32 1e-12, %v786_v39 }
 0x248   :  { %3009 = vrsqrt.f32 %v788_v16 }
 0x24e   :  { %v3008_v46 = vpop.eup %3007 }
 0x24f   :  { %v791_v47 = vmul.f32 %v3008_v46, %v777_v22 }
 0x251   :  { %v799_v54 = vmul.f32 %v2399_v49, %v791_v47 }
 0x252   :  { %v3010_v48 = vpop.eup %3009 }
 0x253   :  { %v792_v52 = vmul.f32 %v3010_v48, %v778_v26  ;;  %v807_v61 = vadd.f32 %v2400_v55, %v799_v54 }
 0x255   :  { %v800_v60 = vmul.f32 %v2399_v49, %v792_v52 }
 0x257   :  { %v808_v1 = vadd.f32 %v2400_v55, %v800_v60 }
 0x2bf   :  { %v2277_v40 = vpop.xlane.xlu0 %2276 }
 0x2c0   :  { %v2280_v41 = vmul.f32 0.0078125, %v2277_v40 }
 0x2c2   :  { %v2282_v42 = vadd.f32 1e-12, %v2280_v41 }
 0x2c3   :  { %v2279_v43 = vpop.xlane.xlu1 %2278 }
 0x2c4   :  { %3011 = vrsqrt.f32 %v2282_v42  ;;  %v2281_v44 = vmul.f32 0.0078125, %v2279_v43 }
 0x2c6   :  { %v2283_v45 = vadd.f32 1e-12, %v2281_v44 }
 0x2c8   :  { %3013 = vrsqrt.f32 %v2283_v45 }
 0x2ce   :  { %v3012_v50 = vpop.eup %3011 }
 0x2cf   :  { %v2286_v53 = vmul.f32 %v3012_v50, %v2272_v30 }
 0x2d1   :  { %v2294_v57 = vmul.f32 %v2546_v51, %v2286_v53 }
 0x2d2   :  { %v3014_v58 = vpop.eup %3013 }
 0x2d3   :  { %v2287_v59 = vmul.f32 %v3014_v58, %v2273_v34  ;;  %v2302_v62 = vadd.f32 %v2547_v56, %v2294_v57 }
 0x2d5   :  { %v2295_v63 = vmul.f32 %v2546_v51, %v2287_v59  ;;  %v2304_v0 = vadd.f32 %v2302_v62, %v807_v61 }
 0x2d7   :  { %v2303_v2 = vadd.f32 %v2547_v56, %v2295_v63  ;;  %v2306_v3 = vmul.f32 0.5, %v2304_v0 }
 0x2d9   :  { %v2305_v4 = vadd.f32 %v2303_v2, %v808_v1  ;;  %2308 = vst [vmem:[#allocation2] sm:$0xff] %v2306_v3 }
 0x2db   :  { %v2307_v5 = vmul.f32 0.5, %v2305_v4 }
 0x2dd   :  { %2309 = vst [vmem:[#allocation2 + $0x8] sm:$0xff] %v2307_v5 }
 0x2de   :  { %3026 = shalt.err (!%p3023_p4)
}
 0x2df   :  { %s3027_s26 = scalar_lea.hbm %s3793_s10, 256 }
 0x2e0   :  { %p3028_p5 = scmp.ne.s32.totalorder %s3793_s10, %s3027_s26  ;;  %p3031_p6 = scmp.lt.u32.totalorder %s3027_s26, %s3793_s10 }
 0x2e2   :  { %p3033_p7 = pnand %p3031_p6, %p3028_p5 }
 0x2e4   :  { %3036 = shalt.err (!%p3033_p7)
}
 0x2e5   :  { %s3040_s11 = smov 128   ;;  %s3041_s12 = smov 8  }
 0x2e6   :  { %2321 = dma.vmem_to_hbm [thread:$0]  %s2316_s8, 256, %s3793_s10, [#allocation3], %s3040_s11, %s3040_s11, %s3041_s12  }
 0x2e7   :  { %3037 = dma.done.wait [#allocation3], 256  }
 0x2e8   :  { %3038 = vsyncadd [#allocation3], 4294967040 }
 0x2e9   :  { %2325 = vsyncpa [#allocation3], 1 }

</bundles_post_ra>
